<compile_context>
chip_gen: v7x
topology: tpu7x:2x2x1
jax: 0.10.0
libtpu: 0.0.40
codegen_flags: <defaults>
</compile_context>

<pallas_src>
import jax
import jax.numpy as jnp
from jax.experimental import pallas as pl
from jax.experimental.pallas import tpu as pltpu


def _round_up(x, m):
    return ((x + m - 1) // m) * m


def residual_mlp_kernel(x_ref, w1_ref, b1_ref, w2_ref, b2_ref, o_ref):
    # x_ref: (tm, Dp), w1: (Dp, Hp), b1: (1, Hp), w2: (Hp, Dp), b2: (1, Dp)
    x = x_ref[...]

    # First matmul: native-dtype operands on the MXU, f32 accumulation.
    h = jnp.dot(x, w1_ref[...], preferred_element_type=jnp.float32)
    h = h + b1_ref[...].astype(jnp.float32)

    # GELU in f32 (VPU + EUP tanh).
    # TODO(synk): PyTorch nn.GELU defaults to exact erf; tanh approximation is
    # used here (and in the reference) for guaranteed Mosaic lowering.
    h = jax.nn.gelu(h, approximate=True)

    # Second matmul: cast the f32 intermediate down to the weight dtype so the
    # MXU runs its native-precision path again, accumulate in f32.
    y = jnp.dot(h.astype(w2_ref.dtype), w2_ref[...],
                preferred_element_type=jnp.float32)
    y = y + b2_ref[...].astype(jnp.float32)

    # Residual add: fn(x) + x, then cast once to the output dtype.
    o_ref[...] = (y + x.astype(jnp.float32)).astype(o_ref.dtype)


def _pallas_forward(x2, w1, b1, w2, b2, *, tm, single_buffer_weights):
    Mp, Dp = x2.shape
    Hp = w1.shape[1]

    # Invariant weights/biases: constant index_map; optionally single-buffered
    # so they don't burn 2x VMEM (matters on v7x's 64 MiB VMEM).
    weight_kwargs = (
        dict(pipeline_mode=pl.Buffered(1)) if single_buffer_weights else {}
    )

    act_bytes = jnp.dtype(x2.dtype).itemsize
    w_bytes = jnp.dtype(w1.dtype).itemsize
    cost = pl.CostEstimate(
        flops=4 * Mp * Dp * Hp,                       # two (Mp x Dp x Hp) matmuls
        transcendentals=Mp * Hp,                      # one tanh per hidden element
        bytes_accessed=(2 * Mp * Dp * act_bytes       # x in + out
                        + (2 * Dp * Hp + Hp + Dp) * w_bytes),
    )

    return pl.pallas_call(
        residual_mlp_kernel,
        out_shape=jax.ShapeDtypeStruct((Mp, Dp), x2.dtype),
        grid_spec=pltpu.PrefetchScalarGridSpec(
            num_scalar_prefetch=0,
            grid=(Mp // tm,),
            in_specs=[
                pl.BlockSpec((tm, Dp), lambda i: (i, 0)),                   # x tile
                pl.BlockSpec((Dp, Hp), lambda i: (0, 0), **weight_kwargs),  # w1
                pl.BlockSpec((1, Hp), lambda i: (0, 0), **weight_kwargs),   # b1
                pl.BlockSpec((Hp, Dp), lambda i: (0, 0), **weight_kwargs),  # w2
                pl.BlockSpec((1, Dp), lambda i: (0, 0), **weight_kwargs),   # b2
            ],
            out_specs=pl.BlockSpec((tm, Dp), lambda i: (i, 0)),
        ),
        compiler_params=pltpu.CompilerParams(
            dimension_semantics=("parallel",),
            vmem_limit_bytes=48 * 1024 * 1024,
        ),
        cost_estimate=cost,
    )(x2, w1, b1, w2, b2)


def residual_mlp(x, w1, b1, w2, b2, *, tm=256):
    """fn(x) + x with fn = Linear(D->H) -> GELU -> Linear(H->D), fused."""
    B, N, D = x.shape
    H = w1.shape[1]
    M = B * N

    # Adaptive row tile: big (256) for large inputs, no larger than needed for
    # small ones (second-last block dim must be a multiple of 8).
    tm_eff = min(tm, max(8, _round_up(M, 8)))

    # Lane-pad feature axes to multiples of 128 (lane-dense loads/stores) and
    # row-pad M to a multiple of the row tile. Zero padding is exact here:
    # padded weight rows/cols contribute 0 and gelu(0) == 0.
    Dp = _round_up(D, 128)
    Hp = _round_up(H, 128)
    Mp = _round_up(M, tm_eff)

    x2 = jnp.pad(x.reshape(M, D), ((0, Mp - M), (0, Dp - D)))
    w1p = jnp.pad(w1, ((0, Dp - D), (0, Hp - H)))
    w2p = jnp.pad(w2, ((0, Hp - H), (0, Dp - D)))
    b1p = jnp.pad(b1, (0, Hp - H)).reshape(1, Hp)
    b2p = jnp.pad(b2, (0, Dp - D)).reshape(1, Dp)

    try:
        out = _pallas_forward(x2, w1p, b1p, w2p, b2p, tm=tm_eff,
                              single_buffer_weights=True)
    except Exception:
        # Fallback if this jax build rejects Buffered(1) single-buffering.
        out = _pallas_forward(x2, w1p, b1p, w2p, b2p, tm=tm_eff,
                              single_buffer_weights=False)

    return out[:M, :D].reshape(B, N, D)


def residual_mlp_ref(x, w1, b1, w2, b2):
    h = jax.nn.gelu(jnp.einsum("bnd,dh->bnh", x, w1) + b1, approximate=True)
    y = jnp.einsum("bnh,hd->bnd", h, w2) + b2
    return y + x


if __name__ == "__main__":
    key = jax.random.PRNGKey(0)
    B, N, D, H = 2, 16, 32, 64
    kx, k1, k2, k3, k4 = jax.random.split(key, 5)

    x = jax.random.normal(kx, (B, N, D), dtype=jnp.float32)
    # Deterministic parameter init for the wrapped fn (Linear -> GELU -> Linear)
    w1 = jax.random.normal(k1, (D, H), dtype=jnp.float32) * (1.0 / jnp.sqrt(D))
    b1 = jax.random.normal(k2, (H,), dtype=jnp.float32) * 0.01
    w2 = jax.random.normal(k3, (H, D), dtype=jnp.float32) * (1.0 / jnp.sqrt(H))
    b2 = jax.random.normal(k4, (D,), dtype=jnp.float32) * 0.01

    out = residual_mlp(x, w1, b1, w2, b2)
    out = jax.block_until_ready(out)

    ref = residual_mlp_ref(x, w1, b1, w2, b2)
    assert out.shape == x.shape and out.dtype == x.dtype
    assert jnp.allclose(out, ref, atol=1e-4, rtol=1e-4), "mismatch vs reference"
    print("KERNEL_OK")
</pallas_src>

<mosaic_0001>
module attributes {stable_mosaic.version = 11 : i64} {
  func.func @residual_mlp_kernel(%arg0: i32, %arg1: memref<32x128xf32, #tpu.memory_space<vmem>>, %arg2: memref<128x128xf32, #tpu.memory_space<vmem>>, %arg3: memref<1x128xf32, #tpu.memory_space<vmem>>, %arg4: memref<128x128xf32, #tpu.memory_space<vmem>>, %arg5: memref<1x128xf32, #tpu.memory_space<vmem>>, %arg6: memref<32x128xf32, #tpu.memory_space<vmem>>) attributes {dimension_semantics = [#tpu.dimension_semantics<parallel>], iteration_bounds = array<i64: 1>, scalar_prefetch = 0 : i64, scratch_operands = 0 : i64, tpu.core_type = #tpu.core_type<tc>, window_params = [{transform_indices = @transform_0, window_bounds = array<i64: 32, 128>}, {pipeline_mode = #tpu.pipeline_mode<synchronous>, transform_indices = @transform_1, window_bounds = array<i64: 128, 128>}, {pipeline_mode = #tpu.pipeline_mode<synchronous>, transform_indices = @transform_2, window_bounds = array<i64: 1, 128>}, {pipeline_mode = #tpu.pipeline_mode<synchronous>, transform_indices = @transform_3, window_bounds = array<i64: 128, 128>}, {pipeline_mode = #tpu.pipeline_mode<synchronous>, transform_indices = @transform_4, window_bounds = array<i64: 1, 128>}, {transform_indices = @transform_5, window_bounds = array<i64: 32, 128>}]} {
    %c0 = arith.constant 0 : index
    %c0_0 = arith.constant 0 : index
    %0 = vector.load %arg1[%c0, %c0_0] : memref<32x128xf32, #tpu.memory_space<vmem>>, vector<32x128xf32>
    %c0_1 = arith.constant 0 : index
    %c0_2 = arith.constant 0 : index
    %1 = vector.load %arg2[%c0_1, %c0_2] : memref<128x128xf32, #tpu.memory_space<vmem>>, vector<128x128xf32>
    %cst = arith.constant dense<0.000000e+00> : vector<32x128xf32>
    %2 = tpu.matmul %0, %1, %cst {dimension_numbers = #tpu.dot_dimension_numbers<[1], [0], [0], [1], [0, 0, 1, 1], [], []>} : vector<32x128xf32>, vector<128x128xf32>, vector<32x128xf32> -> vector<32x128xf32>
    %c0_3 = arith.constant 0 : index
    %c0_4 = arith.constant 0 : index
    %3 = vector.load %arg3[%c0_3, %c0_4] : memref<1x128xf32, #tpu.memory_space<vmem>>, vector<1x128xf32>
    %4 = vector.broadcast %3 : vector<1x128xf32> to vector<32x128xf32>
    %5 = arith.addf %2, %4 : vector<32x128xf32>
    %6 = arith.mulf %5, %5 : vector<32x128xf32>
    %7 = arith.mulf %5, %6 : vector<32x128xf32>
    %cst_5 = arith.constant 4.471500e-02 : f32
    %8 = vector.broadcast %cst_5 : f32 to vector<32x128xf32>
    %9 = arith.mulf %8, %7 : vector<32x128xf32>
    %10 = arith.addf %5, %9 : vector<32x128xf32>
    %cst_6 = arith.constant 0.797884583 : f32
    %11 = vector.broadcast %cst_6 : f32 to vector<32x128xf32>
    %12 = arith.mulf %11, %10 : vector<32x128xf32>
    %13 = math.tanh %12 : vector<32x128xf32>
    %cst_7 = arith.constant 1.000000e+00 : f32
    %14 = vector.broadcast %cst_7 : f32 to vector<32x128xf32>
    %15 = arith.addf %14, %13 : vector<32x128xf32>
    %cst_8 = arith.constant 5.000000e-01 : f32
    %16 = vector.broadcast %cst_8 : f32 to vector<32x128xf32>
    %17 = arith.mulf %16, %15 : vector<32x128xf32>
    %18 = arith.mulf %5, %17 : vector<32x128xf32>
    %c0_9 = arith.constant 0 : index
    %c0_10 = arith.constant 0 : index
    %19 = vector.load %arg4[%c0_9, %c0_10] : memref<128x128xf32, #tpu.memory_space<vmem>>, vector<128x128xf32>
    %cst_11 = arith.constant dense<0.000000e+00> : vector<32x128xf32>
    %20 = tpu.matmul %18, %19, %cst_11 {dimension_numbers = #tpu.dot_dimension_numbers<[1], [0], [0], [1], [0, 0, 1, 1], [], []>} : vector<32x128xf32>, vector<128x128xf32>, vector<32x128xf32> -> vector<32x128xf32>
    %c0_12 = arith.constant 0 : index
    %c0_13 = arith.constant 0 : index
    %21 = vector.load %arg5[%c0_12, %c0_13] : memref<1x128xf32, #tpu.memory_space<vmem>>, vector<1x128xf32>
    %22 = vector.broadcast %21 : vector<1x128xf32> to vector<32x128xf32>
    %23 = arith.addf %20, %22 : vector<32x128xf32>
    %24 = arith.addf %23, %0 : vector<32x128xf32>
    %c0_14 = arith.constant 0 : index
    %c0_15 = arith.constant 0 : index
    %25 = vector.load %arg6[%c0_14, %c0_15] : memref<32x128xf32, #tpu.memory_space<vmem>>, vector<32x128xf32>
    tpu.vector_store %arg6[%c0_14, %c0_15], %24 {strides = array<i32>} : memref<32x128xf32, #tpu.memory_space<vmem>>, vector<32x128xf32>,
    return
  }
  func.func @transform_0(%arg0: i32) -> (i32, i32) {
    %c0_i32 = arith.constant 0 : i32
    %c0_i32_0 = arith.constant 0 : i32
    return %arg0, %c0_i32 : i32, i32
  }
  func.func @transform_1(%arg0: i32) -> (i32, i32) {
    %c0_i32 = arith.constant 0 : i32
    %c0_i32_0 = arith.constant 0 : i32
    %c0_i32_1 = arith.constant 0 : i32
    return %c0_i32, %c0_i32_0 : i32, i32
  }
  func.func @transform_2(%arg0: i32) -> (i32, i32) {
    %c0_i32 = arith.constant 0 : i32
    %c0_i32_0 = arith.constant 0 : i32
    %c0_i32_1 = arith.constant 0 : i32
    return %c0_i32, %c0_i32_0 : i32, i32
  }
  func.func @transform_3(%arg0: i32) -> (i32, i32) {
    %c0_i32 = arith.constant 0 : i32
    %c0_i32_0 = arith.constant 0 : i32
    %c0_i32_1 = arith.constant 0 : i32
    return %c0_i32, %c0_i32_0 : i32, i32
  }
  func.func @transform_4(%arg0: i32) -> (i32, i32) {
    %c0_i32 = arith.constant 0 : i32
    %c0_i32_0 = arith.constant 0 : i32
    %c0_i32_1 = arith.constant 0 : i32
    return %c0_i32, %c0_i32_0 : i32, i32
  }
  func.func @transform_5(%arg0: i32) -> (i32, i32) {
    %c0_i32 = arith.constant 0 : i32
    %c0_i32_0 = arith.constant 0 : i32
    return %arg0, %c0_i32 : i32, i32
  }
}

module attributes {stable_mosaic.version = 11 : i64} {
  func.func @residual_mlp_kernel(%arg0: i32, %arg1: memref<32x128xf32, #tpu.memory_space<vmem>>, %arg2: memref<128x128xf32, #tpu.memory_space<vmem>>, %arg3: memref<1x128xf32, #tpu.memory_space<vmem>>, %arg4: memref<128x128xf32, #tpu.memory_space<vmem>>, %arg5: memref<1x128xf32, #tpu.memory_space<vmem>>, %arg6: memref<32x128xf32, #tpu.memory_space<vmem>>) attributes {dimension_semantics = [#tpu.dimension_semantics<parallel>], iteration_bounds = array<i64: 1>, scalar_prefetch = 0 : i64, scratch_operands = 0 : i64, tpu.core_type = #tpu.core_type<tc>, window_params = [{transform_indices = @transform_0, window_bounds = array<i64: 32, 128>}, {pipeline_mode = #tpu.pipeline_mode<synchronous>, transform_indices = @transform_1, window_bounds = array<i64: 128, 128>}, {pipeline_mode = #tpu.pipeline_mode<synchronous>, transform_indices = @transform_2, window_bounds = array<i64: 1, 128>}, {pipeline_mode = #tpu.pipeline_mode<synchronous>, transform_indices = @transform_3, window_bounds = array<i64: 128, 128>}, {pipeline_mode = #tpu.pipeline_mode<synchronous>, transform_indices = @transform_4, window_bounds = array<i64: 1, 128>}, {transform_indices = @transform_5, window_bounds = array<i64: 32, 128>}]} {
    %c0 = arith.constant 0 : index
    %c0_0 = arith.constant 0 : index
    %0 = vector.load %arg1[%c0, %c0_0] : memref<32x128xf32, #tpu.memory_space<vmem>>, vector<32x128xf32>
    %c0_1 = arith.constant 0 : index
    %c0_2 = arith.constant 0 : index
    %1 = vector.load %arg2[%c0_1, %c0_2] : memref<128x128xf32, #tpu.memory_space<vmem>>, vector<128x128xf32>
    %cst = arith.constant dense<0.000000e+00> : vector<32x128xf32>
    %2 = tpu.matmul %0, %1, %cst {dimension_numbers = #tpu.dot_dimension_numbers<[1], [0], [0], [1], [0, 0, 1, 1], [], []>} : vector<32x128xf32>, vector<128x128xf32>, vector<32x128xf32> -> vector<32x128xf32>
    %c0_3 = arith.constant 0 : index
    %c0_4 = arith.constant 0 : index
    %3 = vector.load %arg3[%c0_3, %c0_4] : memref<1x128xf32, #tpu.memory_space<vmem>>, vector<1x128xf32>
    %4 = vector.broadcast %3 : vector<1x128xf32> to vector<32x128xf32>
    %5 = arith.addf %2, %4 : vector<32x128xf32>
    %6 = arith.mulf %5, %5 : vector<32x128xf32>
    %7 = arith.mulf %5, %6 : vector<32x128xf32>
    %cst_5 = arith.constant 4.471500e-02 : f32
    %8 = vector.broadcast %cst_5 : f32 to vector<32x128xf32>
    %9 = arith.mulf %8, %7 : vector<32x128xf32>
    %10 = arith.addf %5, %9 : vector<32x128xf32>
    %cst_6 = arith.constant 0.797884583 : f32
    %11 = vector.broadcast %cst_6 : f32 to vector<32x128xf32>
    %12 = arith.mulf %11, %10 : vector<32x128xf32>
    %13 = math.tanh %12 : vector<32x128xf32>
    %cst_7 = arith.constant 1.000000e+00 : f32
    %14 = vector.broadcast %cst_7 : f32 to vector<32x128xf32>
    %15 = arith.addf %14, %13 : vector<32x128xf32>
    %cst_8 = arith.constant 5.000000e-01 : f32
    %16 = vector.broadcast %cst_8 : f32 to vector<32x128xf32>
    %17 = arith.mulf %16, %15 : vector<32x128xf32>
    %18 = arith.mulf %5, %17 : vector<32x128xf32>
    %c0_9 = arith.constant 0 : index
    %c0_10 = arith.constant 0 : index
    %19 = vector.load %arg4[%c0_9, %c0_10] : memref<128x128xf32, #tpu.memory_space<vmem>>, vector<128x128xf32>
    %cst_11 = arith.constant dense<0.000000e+00> : vector<32x128xf32>
    %20 = tpu.matmul %18, %19, %cst_11 {dimension_numbers = #tpu.dot_dimension_numbers<[1], [0], [0], [1], [0, 0, 1, 1], [], []>} : vector<32x128xf32>, vector<128x128xf32>, vector<32x128xf32> -> vector<32x128xf32>
    %c0_12 = arith.constant 0 : index
    %c0_13 = arith.constant 0 : index
    %21 = vector.load %arg5[%c0_12, %c0_13] : memref<1x128xf32, #tpu.memory_space<vmem>>, vector<1x128xf32>
    %22 = vector.broadcast %21 : vector<1x128xf32> to vector<32x128xf32>
    %23 = arith.addf %20, %22 : vector<32x128xf32>
    %24 = arith.addf %23, %0 : vector<32x128xf32>
    %c0_14 = arith.constant 0 : index
    %c0_15 = arith.constant 0 : index
    %25 = vector.load %arg6[%c0_14, %c0_15] : memref<32x128xf32, #tpu.memory_space<vmem>>, vector<32x128xf32>
    tpu.vector_store %arg6[%c0_14, %c0_15], %24 {strides = array<i32>} : memref<32x128xf32, #tpu.memory_space<vmem>>, vector<32x128xf32>,
    return
  }
  func.func @transform_0(%arg0: i32) -> (i32, i32) {
    %c0_i32 = arith.constant 0 : i32
    %c0_i32_0 = arith.constant 0 : i32
    return %arg0, %c0_i32 : i32, i32
  }
  func.func @transform_1(%arg0: i32) -> (i32, i32) {
    %c0_i32 = arith.constant 0 : i32
    %c0_i32_0 = arith.constant 0 : i32
    %c0_i32_1 = arith.constant 0 : i32
    return %c0_i32, %c0_i32_0 : i32, i32
  }
  func.func @transform_2(%arg0: i32) -> (i32, i32) {
    %c0_i32 = arith.constant 0 : i32
    %c0_i32_0 = arith.constant 0 : i32
    %c0_i32_1 = arith.constant 0 : i32
    return %c0_i32, %c0_i32_0 : i32, i32
  }
  func.func @transform_3(%arg0: i32) -> (i32, i32) {
    %c0_i32 = arith.constant 0 : i32
    %c0_i32_0 = arith.constant 0 : i32
    %c0_i32_1 = arith.constant 0 : i32
    return %c0_i32, %c0_i32_0 : i32, i32
  }
  func.func @transform_4(%arg0: i32) -> (i32, i32) {
    %c0_i32 = arith.constant 0 : i32
    %c0_i32_0 = arith.constant 0 : i32
    %c0_i32_1 = arith.constant 0 : i32
    return %c0_i32, %c0_i32_0 : i32, i32
  }
  func.func @transform_5(%arg0: i32) -> (i32, i32) {
    %c0_i32 = arith.constant 0 : i32
    %c0_i32_0 = arith.constant 0 : i32
    return %arg0, %c0_i32 : i32, i32
  }
}

</mosaic_0001>

<bundles_post_ra>
// kernel: tpu_custom_call.1
= control target key start
LH: loop header
LB: loop body
LE: loop exit
PB: predicated region body
PF: predicated region fallthrough
CT: control target
= control target key end

     0   :  { %10 = vsyncpa [#allocation3], 0  ;;  %s759_s0 = inlined_call_operand.hbm [shape: f32[32,128], index: 0, kind: input, shape index: {}]   ;;  %s760_s1 = inlined_call_operand.hbm [shape: f32[128,128], index: 1, kind: input, shape index: {}]   ;;  %s761_s2 = inlined_call_operand.vmem [shape: f32[1,128], index: 2, kind: input, shape index: {}]   ;;  %s762_s3 = inlined_call_operand.hbm [shape: f32[128,128], index: 3, kind: input, shape index: {}]   ;;  %s763_s4 = inlined_call_operand.vmem [shape: f32[1,128], index: 4, kind: input, shape index: {}]   ;;  %s764_s5 = inlined_call_operand.hbm [shape: f32[32,128], index: 5, kind: output, shape index: {}]  }
   0x1   :  { %11 = vsyncpa [#allocation6], 0 }
   0x2   :  { %12 = vsyncpa [#allocation4], 0  ;;  %s634_s18 = smov [#allocation5]   ;;  %s635_s20 = smov [#allocation2]  }
   0x3   :  { %s30_s19 = sshll.u32 %s634_s18, 4  ;;  %s18_s21 = sshll.u32 %s635_s20, 4  ;;  %s31_s19 = int_to_ptr.vmem [resolvable:$true] %s30_s19  ;;  %s670_s21 = int_to_ptr.vmem [resolvable:$true] %s18_s21 }
   0x4   :  { %s540_s24 = scalar_lea.hbm %s760_s1, 2048 }
   0x5   :  { %p541_p0 = scmp.ne.s32.totalorder %s760_s1, %s540_s24  ;;  %p544_p1 = scmp.lt.u32.totalorder %s540_s24, %s760_s1 }
   0x7   :  { %p546_p2 = pnand %p544_p1, %p541_p0 }
   0x9   :  { %549 = shalt.err (!%p546_p2)
}
   0xa   :  { %s550_s29 = scalar_lea.vmem %s31_s19, 2048  ;;  %p555_p4 = scmp.lt.s32.totalorder %s31_s19, %s31_s19 }
   0xb   :  { %p551_p3 = scmp.ne.s32.totalorder %s31_s19, %s550_s29  ;;  %p556_p5 = scmp.lt.s32.totalorder %s550_s29, %s550_s29 }
   0xd   :  { %p557_p6 = por %p556_p5, %p555_p4 }
   0xf   :  { %p558_p7 = pnand %p557_p6, %p551_p3 }
  0x11   :  { %561 = shalt.err (!%p558_p7)
}
  0x12   :  { %s636_s30 = smov 128   ;;  %s637_s6 = smov 8  }
  0x13   :  { %36 = dma.hbm_to_vmem [thread:$0]  %s760_s1, 2048, %s31_s19, [#allocation6], %s636_s30, %s636_s30, %s637_s6  }
  0x14   :  { %s562_s11 = scalar_lea.hbm %s759_s0, 512 }
  0x15   :  { %p563_p8 = scmp.ne.s32.totalorder %s759_s0, %s562_s11  ;;  %p566_p9 = scmp.lt.u32.totalorder %s562_s11, %s759_s0 }
  0x17   :  { %p568_p10 = pnand %p566_p9, %p563_p8 }
  0x19   :  { %571 = shalt.err (!%p568_p10)
}
  0x1a   :  { %s572_s16 = scalar_lea.vmem %s670_s21, 512  ;;  %p577_p12 = scmp.lt.s32.totalorder %s670_s21, %s670_s21 }
  0x1b   :  { %p573_p11 = scmp.ne.s32.totalorder %s670_s21, %s572_s16  ;;  %p578_p13 = scmp.lt.s32.totalorder %s572_s16, %s572_s16 }
  0x1d   :  { %p579_p0 = por %p578_p13, %p577_p12 }
  0x1f   :  { %p580_p1 = pnand %p579_p0, %p573_p11 }
  0x21   :  { %583 = shalt.err (!%p580_p1)
}
  0x22   :  { %24 = dma.hbm_to_vmem [thread:$0]  %s759_s0, 512, %s670_s21, [#allocation3], %s636_s30, %s636_s30, %s637_s6  }
  0x23   :  { %s638_s18 = smov [#allocation7]   ;;  %s584_s23 = scalar_lea.hbm %s762_s3, 2048 }
  0x24   :  { %s44_s19 = sshll.u32 %s638_s18, 4  ;;  %p585_p2 = scmp.ne.s32.totalorder %s762_s3, %s584_s23  ;;  %s45_s19 = int_to_ptr.vmem [resolvable:$true] %s44_s19 }
  0x25   :  { %p588_p3 = scmp.lt.u32.totalorder %s584_s23, %s762_s3 }
  0x27   :  { %p590_p4 = pnand %p588_p3, %p585_p2 }
  0x29   :  { %593 = shalt.err (!%p590_p4)
}
  0x2a   :  { %s594_s28 = scalar_lea.vmem %s45_s19, 2048  ;;  %p599_p6 = scmp.lt.s32.totalorder %s45_s19, %s45_s19 }
  0x2b   :  { %p595_p5 = scmp.ne.s32.totalorder %s45_s19, %s594_s28  ;;  %p600_p7 = scmp.lt.s32.totalorder %s594_s28, %s594_s28 }
  0x2d   :  { %p601_p8 = por %p600_p7, %p599_p6 }
  0x2f   :  { %p602_p9 = pnand %p601_p8, %p595_p5 }
  0x31   :  { %605 = shalt.err (!%p602_p9)
}
  0x32   :  { %50 = dma.hbm_to_vmem [thread:$0]  %s762_s3, 2048, %s45_s19, [#allocation6], %s636_s30, %s636_s30, %s637_s6  }
  0x33   :  { %628 = dma.done.wait [#allocation3], 512  }
  0x34   :  { %629 = vsyncadd [#allocation3], 4294966784 }
  0x35   :  { %630 = dma.done.wait [#allocation6], 4096  }
  0x36   :  { %631 = vsyncadd [#allocation6], 4294963200  ;;  %v66_v0 = vld [vmem:[#allocation5] sm:$0xff]  ;;  %v67_v1 = vld [vmem:[#allocation5 + $0x8] sm:$0xff]  ;;  %s639_s8 = smov [#allocation8]  }
  0x37   :  { %v68_v2 = vld [vmem:[#allocation5 + $0x10] sm:$0xff]  ;;  %v462_v3 = vpack.c.bf16 %v67_v1, %v66_v0  ;;  %v69_v4 = vld [vmem:[#allocation5 + $0x18] sm:$0xff]  ;;  %v70_v6 = vld [vmem:[#allocation5 + $0x20] sm:$0xff]  ;;  %s331_s9 = sshll.u32 %s639_s8, 4  ;;  %s332_s9 = int_to_ptr.vmem [resolvable:$true] %s331_s9 }
  0x38   :  { %v466_v5 = vpack.c.bf16 %v69_v4, %v68_v2  ;;  %v71_v7 = vld [vmem:[#allocation5 + $0x28] sm:$0xff]  ;;  %v722_v9 = vld [vmem:[#allocation2] sm:$0xff]  ;;  %v72_v10 = vld [vmem:[#allocation5 + $0x30] sm:$0xff]  ;;  %p611_p11 = scmp.lt.s32.totalorder %s332_s9, %s332_s9 }
  0x39   :  { %463 = vmatprep.subr.bf16.mxu0 %v462_v3  ;;  %v470_v8 = vpack.c.bf16 %v71_v7, %v70_v6  ;;  %v73_v11 = vld [vmem:[#allocation5 + $0x38] sm:$0xff]  ;;  %418 = vmatprep.mubr.f32.mxu0 %v722_v9  ;;  %v74_v13 = vld [vmem:[#allocation5 + $0x40] sm:$0xff]  ;;  %v75_v14 = vld [vmem:[#allocation5 + $0x48] sm:$0xff] }
  0x3a   :  { %465 = vmatpush3.bf16.msra.mxu0 %v462_v3  ;;  %v474_v12 = vpack.c.bf16 %v73_v11, %v72_v10  ;;  %v478_v15 = vpack.c.bf16 %v75_v14, %v74_v13  ;;  %v76_v16 = vld [vmem:[#allocation5 + $0x50] sm:$0xff]  ;;  %v77_v17 = vld [vmem:[#allocation5 + $0x58] sm:$0xff]  ;;  %v78_v19 = vld [vmem:[#allocation5 + $0x60] sm:$0xff] }
  0x3b   :  { %467 = vmatprep.subr.bf16.mxu0 %v466_v5  ;;  %v482_v18 = vpack.c.bf16 %v77_v17, %v76_v16  ;;  %v79_v20 = vld [vmem:[#allocation5 + $0x68] sm:$0xff]  ;;  %v80_v22 = vld [vmem:[#allocation5 + $0x70] sm:$0xff]  ;;  %v81_v23 = vld [vmem:[#allocation5 + $0x78] sm:$0xff] }
  0x3c   :  { %v486_v21 = vpack.c.bf16 %v79_v20, %v78_v19  ;;  %v490_v24 = vpack.c.bf16 %v81_v23, %v80_v22  ;;  %v725_v25 = vld [vmem:[#allocation2 + $0x8] sm:$0xff]  ;;  %v727_v26 = vld [vmem:[#allocation2 + $0x10] sm:$0xff]  ;;  %v731_v27 = vld [vmem:[#allocation2 + $0x18] sm:$0xff] }
  0x3d   :  { %v210_v28 = vld [vmem:[#allocation7] sm:$0xff]  ;;  %v211_v29 = vld [vmem:[#allocation7 + $0x8] sm:$0xff]  ;;  %v212_v31 = vld [vmem:[#allocation7 + $0x10] sm:$0xff] }
  0x3e   :  { %469 = vmatpush3.bf16.msra.mxu0 %v466_v5  ;;  %v494_v30 = vpack.c.bf16 %v211_v29, %v210_v28  ;;  %v213_v32 = vld [vmem:[#allocation7 + $0x18] sm:$0xff]  ;;  %v214_v34 = vld [vmem:[#allocation7 + $0x20] sm:$0xff]  ;;  %v215_v35 = vld [vmem:[#allocation7 + $0x28] sm:$0xff] }
  0x3f   :  { %471 = vmatprep.subr.bf16.mxu0 %v470_v8  ;;  %v498_v33 = vpack.c.bf16 %v213_v32, %v212_v31  ;;  %v502_v36 = vpack.c.bf16 %v215_v35, %v214_v34  ;;  %v216_v37 = vld [vmem:[#allocation7 + $0x30] sm:$0xff]  ;;  %v217_v38 = vld [vmem:[#allocation7 + $0x38] sm:$0xff]  ;;  %v218_v40 = vld [vmem:[#allocation7 + $0x40] sm:$0xff] }
  0x40   :  { %495 = vmatprep.subr.bf16.mxu1 %v494_v30  ;;  %v506_v39 = vpack.c.bf16 %v217_v38, %v216_v37  ;;  %v219_v41 = vld [vmem:[#allocation7 + $0x48] sm:$0xff]  ;;  %v220_v43 = vld [vmem:[#allocation7 + $0x50] sm:$0xff]  ;;  %v221_v44 = vld [vmem:[#allocation7 + $0x58] sm:$0xff] }
  0x41   :  { %497 = vmatpush3.bf16.msra.mxu1 %v494_v30  ;;  %v510_v42 = vpack.c.bf16 %v219_v41, %v218_v40  ;;  %v222_v45 = vld [vmem:[#allocation7 + $0x60] sm:$0xff]  ;;  %v514_v46 = vpack.c.bf16 %v221_v44, %v220_v43  ;;  %v223_v47 = vld [vmem:[#allocation7 + $0x68] sm:$0xff]  ;;  %v224_v49 = vld [vmem:[#allocation7 + $0x70] sm:$0xff] }
  0x42   :  { %473 = vmatpush3.bf16.msra.mxu0 %v470_v8  ;;  %499 = vmatprep.subr.bf16.mxu1 %v498_v33  ;;  %v518_v48 = vpack.c.bf16 %v223_v47, %v222_v45  ;;  %v225_v50 = vld [vmem:[#allocation7 + $0x78] sm:$0xff]  ;;  %v344_v52 = vld [vmem:[%s761_s2] ss:$0 sm:$0xff] }
  0x43   :  { %475 = vmatprep.subr.bf16.mxu0 %v474_v12  ;;  %v522_v51 = vpack.c.bf16 %v225_v50, %v224_v49  ;;  %v345_v37 = vld [vmem:[%s763_s4] ss:$0 sm:$0xff]  ;;  %s606_s4 = scalar_lea.vmem %s332_s9, 512 }
  0x44   :  { %p607_p10 = scmp.ne.s32.totalorder %s332_s9, %s606_s4  ;;  %p612_p12 = scmp.lt.s32.totalorder %s606_s4, %s606_s4 }
  0x45   :  { %501 = vmatpush3.bf16.msra.mxu1 %v498_v33 }
  0x46   :  { %477 = vmatpush3.bf16.msra.mxu0 %v474_v12  ;;  %503 = vmatprep.subr.bf16.mxu1 %v502_v36  ;;  %p613_p13 = por %p612_p12, %p611_p11 }
  0x47   :  { %479 = vmatprep.subr.bf16.mxu0 %v478_v15 }
  0x48   :  { %p614_p0 = pnand %p613_p13, %p607_p10 }
  0x49   :  { %505 = vmatpush3.bf16.msra.mxu1 %v502_v36 }
  0x4a   :  { %481 = vmatpush3.bf16.msra.mxu0 %v478_v15  ;;  %507 = vmatprep.subr.bf16.mxu1 %v506_v39 }
  0x4b   :  { %483 = vmatprep.subr.bf16.mxu0 %v482_v18 }
  0x4d   :  { %509 = vmatpush3.bf16.msra.mxu1 %v506_v39 }
  0x4e   :  { %485 = vmatpush3.bf16.msra.mxu0 %v482_v18  ;;  %511 = vmatprep.subr.bf16.mxu1 %v510_v42 }
  0x4f   :  { %487 = vmatprep.subr.bf16.mxu0 %v486_v21 }
  0x51   :  { %513 = vmatpush3.bf16.msra.mxu1 %v510_v42 }
  0x52   :  { %489 = vmatpush3.bf16.msra.mxu0 %v486_v21  ;;  %515 = vmatprep.subr.bf16.mxu1 %v514_v46 }
  0x53   :  { %491 = vmatprep.subr.bf16.mxu0 %v490_v24 }
  0x55   :  { %517 = vmatpush3.bf16.msra.mxu1 %v514_v46 }
  0x56   :  { %493 = vmatpush3.bf16.msra.mxu0 %v490_v24  ;;  %519 = vmatprep.subr.bf16.mxu1 %v518_v48 }
  0x59   :  { %419 = vmatmul.mubr.f32.vlgmr.msra.gmra.mrb[0].mxu0 %v725_v25  ;;  %521 = vmatpush3.bf16.msra.mxu1 %v518_v48 }
  0x5a   :  { %421 = vmatprep.mubr.f32.mxu0 %v727_v26  ;;  %523 = vmatprep.subr.bf16.mxu1 %v522_v51 }
  0x5d   :  { %422 = vmatmul.mubr.f32.gmra.mrb[2].mxu0 %v731_v27  ;;  %525 = vmatpush3.bf16.msra.mxu1 %v522_v51 }
 0x12c   :  { %v420_v53 = vpop.f32.mrb[0].mxu0 }
 0x12d   :  { %v161_v54 = vadd.f32 %v420_v53, %v344_v52  ;;  %v155_v55 = vpop.f32.mrb[1].mxu0 }
 0x12e   :  { %v156_v56 = vadd.f32 %v344_v52, %v155_v55 }
 0x12f   :  { %v175_v57 = vmul.f32 %v161_v54, %v161_v54 }
 0x130   :  { %v174_v58 = vmul.f32 %v156_v56, %v156_v56  ;;  %v423_v59 = vpop.f32.mrb[2].mxu0 }
 0x131   :  { %v179_v60 = vmul.f32 %v175_v57, %v161_v54  ;;  %v171_v61 = vadd.f32 %v423_v59, %v344_v52  ;;  %v165_v62 = vpop.f32.mrb[3].mxu0 }
 0x132   :  { %v178_v63 = vmul.f32 %v174_v58, %v156_v56  ;;  %v166_v0 = vadd.f32 %v344_v52, %v165_v62 }
 0x133   :  { %v183_v1 = vmul.f32 0.044715, %v179_v60  ;;  %v177_v2 = vmul.f32 %v171_v61, %v171_v61 }
 0x134   :  { %v176_v3 = vmul.f32 %v166_v0, %v166_v0  ;;  %v182_v4 = vmul.f32 0.044715, %v178_v63 }
 0x135   :  { %v187_v5 = vadd.f32 %v183_v1, %v161_v54  ;;  %v181_v6 = vmul.f32 %v177_v2, %v171_v61 }
 0x136   :  { %v180_v7 = vmul.f32 %v176_v3, %v166_v0  ;;  %v186_v8 = vadd.f32 %v182_v4, %v156_v56 }
 0x137   :  { %v191_v10 = vmul.f32 0.7978846, %v187_v5  ;;  %v185_v11 = vmul.f32 0.044715, %v181_v6 }
 0x138   :  { %v184_v12 = vmul.f32 0.044715, %v180_v7  ;;  %v190_v13 = vmul.f32 0.7978846, %v186_v8 }
 0x139   :  { %v189_v14 = vadd.f32 %v185_v11, %v171_v61  ;;  %532 = vtanh.f32 %v191_v10 }
 0x13a   :  { %v188_v15 = vadd.f32 %v184_v12, %v166_v0  ;;  %534 = vtanh.f32 %v190_v13 }
 0x13b   :  { %v193_v16 = vmul.f32 0.7978846, %v189_v14 }
 0x13c   :  { %v192_v17 = vmul.f32 0.7978846, %v188_v15 }
 0x13d   :  { %536 = vtanh.f32 %v193_v16 }
 0x13e   :  { %538 = vtanh.f32 %v192_v17 }
 0x143   :  { %v533_v18 = vpop.eup %532 }
 0x144   :  { %v535_v19 = vpop.eup %534  ;;  %v199_v20 = vadd.f32 1.0, %v533_v18 }
 0x145   :  { %v198_v21 = vadd.f32 1.0, %v535_v19 }
 0x146   :  { %v203_v22 = vmul.f32 0.5, %v199_v20 }
 0x147   :  { %v537_v23 = vpop.eup %536  ;;  %v202_v24 = vmul.f32 0.5, %v198_v21 }
 0x148   :  { %v539_v28 = vpop.eup %538  ;;  %v201_v29 = vadd.f32 1.0, %v537_v23  ;;  %v207_v32 = vmul.f32 %v203_v22, %v161_v54 }
 0x149   :  { %v206_v30 = vmul.f32 %v202_v24, %v156_v56  ;;  %v200_v31 = vadd.f32 1.0, %v539_v28 }
 0x14a   :  { %v205_v33 = vmul.f32 0.5, %v201_v29 }
 0x14b   :  { %456 = vmatprep.mubr.f32.mxu1 %v206_v30  ;;  %v204_v34 = vmul.f32 0.5, %v200_v31 }
 0x14c   :  { %457 = vmatmul.mubr.f32.vlgmr.msra.gmra.mrb[0].mxu1 %v207_v32  ;;  %v209_v36 = vmul.f32 %v205_v33, %v171_v61 }
 0x14d   :  { %v208_v35 = vmul.f32 %v204_v34, %v166_v0 }
 0x14f   :  { %459 = vmatprep.mubr.f32.mxu1 %v208_v35 }
 0x150   :  { %460 = vmatmul.mubr.f32.gmra.mrb[2].mxu1 %v209_v36 }
 0x21f   :  { %v458_v38 = vpop.f32.mrb[0].mxu1 }
 0x220   :  { %v305_v39 = vadd.f32 %v458_v38, %v345_v37  ;;  %v299_v40 = vpop.f32.mrb[1].mxu1 }
 0x221   :  { %v300_v41 = vadd.f32 %v345_v37, %v299_v40 }
 0x222   :  { %v319_v42 = vadd.f32 %v305_v39, %v725_v25 }
 0x223   :  { %v318_v43 = vadd.f32 %v300_v41, %v722_v9  ;;  %v461_v44 = vpop.f32.mrb[2].mxu1 }
 0x224   :  { %323 = vst [vmem:[#allocation8 + $0x8] sm:$0xff] %v319_v42  ;;  %v315_v45 = vadd.f32 %v461_v44, %v345_v37  ;;  %v309_v46 = vpop.f32.mrb[3].mxu1 }
 0x225   :  { %322 = vst [vmem:[#allocation8] sm:$0xff] %v318_v43  ;;  %v310_v47 = vadd.f32 %v345_v37, %v309_v46 }
 0x226   :  { %v321_v48 = vadd.f32 %v315_v45, %v731_v27 }
 0x227   :  { %v320_v49 = vadd.f32 %v310_v47, %v727_v26 }
 0x228   :  { %325 = vst [vmem:[#allocation8 + $0x18] sm:$0xff] %v321_v48 }
 0x229   :  { %324 = vst [vmem:[#allocation8 + $0x10] sm:$0xff] %v320_v49 }
 0x22a   :  { %617 = shalt.err (!%p614_p0)
}
 0x22b   :  { %s618_s12 = scalar_lea.hbm %s764_s5, 512 }
 0x22c   :  { %p619_p1 = scmp.ne.s32.totalorder %s764_s5, %s618_s12  ;;  %p622_p2 = scmp.lt.u32.totalorder %s618_s12, %s764_s5 }
 0x22e   :  { %p624_p3 = pnand %p622_p2, %p619_p1 }
 0x230   :  { %627 = shalt.err (!%p624_p3)
}
 0x231   :  { %337 = dma.vmem_to_hbm [thread:$0]  %s332_s9, 512, %s764_s5, [#allocation4], %s636_s30, %s636_s30, %s637_s6  }
 0x232   :  { %632 = dma.done.wait [#allocation4], 512  }
 0x233   :  { %633 = vsyncadd [#allocation4], 4294966784 }
 0x234   :  { %341 = vsyncpa [#allocation3], 1 }
 0x235   :  { %342 = vsyncpa [#allocation6], 1 }
 0x236   :  { %343 = vsyncpa [#allocation4], 1 }

// kernel: tpu_custom_call.1
= control target key start
LH: loop header
LB: loop body
LE: loop exit
PB: predicated region body
PF: predicated region fallthrough
CT: control target
= control target key end

     0   :  { %10 = vsyncpa [#allocation3], 0  ;;  %s759_s0 = inlined_call_operand.hbm [shape: f32[32,128], index: 0, kind: input, shape index: {}]   ;;  %s760_s1 = inlined_call_operand.hbm [shape: f32[128,128], index: 1, kind: input, shape index: {}]   ;;  %s761_s2 = inlined_call_operand.vmem [shape: f32[1,128], index: 2, kind: input, shape index: {}]   ;;  %s762_s3 = inlined_call_operand.hbm [shape: f32[128,128], index: 3, kind: input, shape index: {}]   ;;  %s763_s4 = inlined_call_operand.vmem [shape: f32[1,128], index: 4, kind: input, shape index: {}]   ;;  %s764_s5 = inlined_call_operand.hbm [shape: f32[32,128], index: 5, kind: output, shape index: {}]  }
   0x1   :  { %11 = vsyncpa [#allocation6], 0 }
   0x2   :  { %12 = vsyncpa [#allocation4], 0  ;;  %s634_s18 = smov [#allocation5]   ;;  %s635_s20 = smov [#allocation2]  }
   0x3   :  { %s30_s19 = sshll.u32 %s634_s18, 4  ;;  %s18_s21 = sshll.u32 %s635_s20, 4  ;;  %s31_s19 = int_to_ptr.vmem [resolvable:$true] %s30_s19  ;;  %s670_s21 = int_to_ptr.vmem [resolvable:$true] %s18_s21 }
   0x4   :  { %s540_s24 = scalar_lea.hbm %s760_s1, 2048 }
   0x5   :  { %p541_p0 = scmp.ne.s32.totalorder %s760_s1, %s540_s24  ;;  %p544_p1 = scmp.lt.u32.totalorder %s540_s24, %s760_s1 }
   0x7   :  { %p546_p2 = pnand %p544_p1, %p541_p0 }
   0x9   :  { %549 = shalt.err (!%p546_p2)
}
   0xa   :  { %s550_s29 = scalar_lea.vmem %s31_s19, 2048  ;;  %p555_p4 = scmp.lt.s32.totalorder %s31_s19, %s31_s19 }
   0xb   :  { %p551_p3 = scmp.ne.s32.totalorder %s31_s19, %s550_s29  ;;  %p556_p5 = scmp.lt.s32.totalorder %s550_s29, %s550_s29 }
   0xd   :  { %p557_p6 = por %p556_p5, %p555_p4 }
   0xf   :  { %p558_p7 = pnand %p557_p6, %p551_p3 }
  0x11   :  { %561 = shalt.err (!%p558_p7)
}
  0x12   :  { %s636_s30 = smov 128   ;;  %s637_s6 = smov 8  }
  0x13   :  { %36 = dma.hbm_to_vmem [thread:$0]  %s760_s1, 2048, %s31_s19, [#allocation6], %s636_s30, %s636_s30, %s637_s6  }
  0x14   :  { %s562_s11 = scalar_lea.hbm %s759_s0, 512 }
  0x15   :  { %p563_p8 = scmp.ne.s32.totalorder %s759_s0, %s562_s11  ;;  %p566_p9 = scmp.lt.u32.totalorder %s562_s11, %s759_s0 }
  0x17   :  { %p568_p10 = pnand %p566_p9, %p563_p8 }
  0x19   :  { %571 = shalt.err (!%p568_p10)
}
  0x1a   :  { %s572_s16 = scalar_lea.vmem %s670_s21, 512  ;;  %p577_p12 = scmp.lt.s32.totalorder %s670_s21, %s670_s21 }
  0x1b   :  { %p573_p11 = scmp.ne.s32.totalorder %s670_s21, %s572_s16  ;;  %p578_p13 = scmp.lt.s32.totalorder %s572_s16, %s572_s16 }
  0x1d   :  { %p579_p0 = por %p578_p13, %p577_p12 }
  0x1f   :  { %p580_p1 = pnand %p579_p0, %p573_p11 }
  0x21   :  { %583 = shalt.err (!%p580_p1)
}
  0x22   :  { %24 = dma.hbm_to_vmem [thread:$0]  %s759_s0, 512, %s670_s21, [#allocation3], %s636_s30, %s636_s30, %s637_s6  }
  0x23   :  { %s638_s18 = smov [#allocation7]   ;;  %s584_s23 = scalar_lea.hbm %s762_s3, 2048 }
  0x24   :  { %s44_s19 = sshll.u32 %s638_s18, 4  ;;  %p585_p2 = scmp.ne.s32.totalorder %s762_s3, %s584_s23  ;;  %s45_s19 = int_to_ptr.vmem [resolvable:$true] %s44_s19 }
  0x25   :  { %p588_p3 = scmp.lt.u32.totalorder %s584_s23, %s762_s3 }
  0x27   :  { %p590_p4 = pnand %p588_p3, %p585_p2 }
  0x29   :  { %593 = shalt.err (!%p590_p4)
}
  0x2a   :  { %s594_s28 = scalar_lea.vmem %s45_s19, 2048  ;;  %p599_p6 = scmp.lt.s32.totalorder %s45_s19, %s45_s19 }
  0x2b   :  { %p595_p5 = scmp.ne.s32.totalorder %s45_s19, %s594_s28  ;;  %p600_p7 = scmp.lt.s32.totalorder %s594_s28, %s594_s28 }
  0x2d   :  { %p601_p8 = por %p600_p7, %p599_p6 }
  0x2f   :  { %p602_p9 = pnand %p601_p8, %p595_p5 }
  0x31   :  { %605 = shalt.err (!%p602_p9)
}
  0x32   :  { %50 = dma.hbm_to_vmem [thread:$0]  %s762_s3, 2048, %s45_s19, [#allocation6], %s636_s30, %s636_s30, %s637_s6  }
  0x33   :  { %628 = dma.done.wait [#allocation3], 512  }
  0x34   :  { %629 = vsyncadd [#allocation3], 4294966784 }
  0x35   :  { %630 = dma.done.wait [#allocation6], 4096  }
  0x36   :  { %631 = vsyncadd [#allocation6], 4294963200  ;;  %v66_v0 = vld [vmem:[#allocation5] sm:$0xff]  ;;  %v67_v1 = vld [vmem:[#allocation5 + $0x8] sm:$0xff]  ;;  %s639_s8 = smov [#allocation8]  }
  0x37   :  { %v68_v2 = vld [vmem:[#allocation5 + $0x10] sm:$0xff]  ;;  %v462_v3 = vpack.c.bf16 %v67_v1, %v66_v0  ;;  %v69_v4 = vld [vmem:[#allocation5 + $0x18] sm:$0xff]  ;;  %v70_v6 = vld [vmem:[#allocation5 + $0x20] sm:$0xff]  ;;  %s331_s9 = sshll.u32 %s639_s8, 4  ;;  %s332_s9 = int_to_ptr.vmem [resolvable:$true] %s331_s9 }
  0x38   :  { %v466_v5 = vpack.c.bf16 %v69_v4, %v68_v2  ;;  %v71_v7 = vld [vmem:[#allocation5 + $0x28] sm:$0xff]  ;;  %v722_v9 = vld [vmem:[#allocation2] sm:$0xff]  ;;  %v72_v10 = vld [vmem:[#allocation5 + $0x30] sm:$0xff]  ;;  %p611_p11 = scmp.lt.s32.totalorder %s332_s9, %s332_s9 }
  0x39   :  { %463 = vmatprep.subr.bf16.mxu0 %v462_v3  ;;  %v470_v8 = vpack.c.bf16 %v71_v7, %v70_v6  ;;  %v73_v11 = vld [vmem:[#allocation5 + $0x38] sm:$0xff]  ;;  %418 = vmatprep.mubr.f32.mxu0 %v722_v9  ;;  %v74_v13 = vld [vmem:[#allocation5 + $0x40] sm:$0xff]  ;;  %v75_v14 = vld [vmem:[#allocation5 + $0x48] sm:$0xff] }
  0x3a   :  { %465 = vmatpush3.bf16.msra.mxu0 %v462_v3  ;;  %v474_v12 = vpack.c.bf16 %v73_v11, %v72_v10  ;;  %v478_v15 = vpack.c.bf16 %v75_v14, %v74_v13  ;;  %v76_v16 = vld [vmem:[#allocation5 + $0x50] sm:$0xff]  ;;  %v77_v17 = vld [vmem:[#allocation5 + $0x58] sm:$0xff]  ;;  %v78_v19 = vld [vmem:[#allocation5 + $0x60] sm:$0xff] }
  0x3b   :  { %467 = vmatprep.subr.bf16.mxu0 %v466_v5  ;;  %v482_v18 = vpack.c.bf16 %v77_v17, %v76_v16  ;;  %v79_v20 = vld [vmem:[#allocation5 + $0x68] sm:$0xff]  ;;  %v80_v22 = vld [vmem:[#allocation5 + $0x70] sm:$0xff]  ;;  %v81_v23 = vld [vmem:[#allocation5 + $0x78] sm:$0xff] }
  0x3c   :  { %v486_v21 = vpack.c.bf16 %v79_v20, %v78_v19  ;;  %v490_v24 = vpack.c.bf16 %v81_v23, %v80_v22  ;;  %v725_v25 = vld [vmem:[#allocation2 + $0x8] sm:$0xff]  ;;  %v727_v26 = vld [vmem:[#allocation2 + $0x10] sm:$0xff]  ;;  %v731_v27 = vld [vmem:[#allocation2 + $0x18] sm:$0xff] }
  0x3d   :  { %v210_v28 = vld [vmem:[#allocation7] sm:$0xff]  ;;  %v211_v29 = vld [vmem:[#allocation7 + $0x8] sm:$0xff]  ;;  %v212_v31 = vld [vmem:[#allocation7 + $0x10] sm:$0xff] }
  0x3e   :  { %469 = vmatpush3.bf16.msra.mxu0 %v466_v5  ;;  %v494_v30 = vpack.c.bf16 %v211_v29, %v210_v28  ;;  %v213_v32 = vld [vmem:[#allocation7 + $0x18] sm:$0xff]  ;;  %v214_v34 = vld [vmem:[#allocation7 + $0x20] sm:$0xff]  ;;  %v215_v35 = vld [vmem:[#allocation7 + $0x28] sm:$0xff] }
  0x3f   :  { %471 = vmatprep.subr.bf16.mxu0 %v470_v8  ;;  %v498_v33 = vpack.c.bf16 %v213_v32, %v212_v31  ;;  %v502_v36 = vpack.c.bf16 %v215_v35, %v214_v34  ;;  %v216_v37 = vld [vmem:[#allocation7 + $0x30] sm:$0xff]  ;;  %v217_v38 = vld [vmem:[#allocation7 + $0x38] sm:$0xff]  ;;  %v218_v40 = vld [vmem:[#allocation7 + $0x40] sm:$0xff] }
  0x40   :  { %495 = vmatprep.subr.bf16.mxu1 %v494_v30  ;;  %v506_v39 = vpack.c.bf16 %v217_v38, %v216_v37  ;;  %v219_v41 = vld [vmem:[#allocation7 + $0x48] sm:$0xff]  ;;  %v220_v43 = vld [vmem:[#allocation7 + $0x50] sm:$0xff]  ;;  %v221_v44 = vld [vmem:[#allocation7 + $0x58] sm:$0xff] }
  0x41   :  { %497 = vmatpush3.bf16.msra.mxu1 %v494_v30  ;;  %v510_v42 = vpack.c.bf16 %v219_v41, %v218_v40  ;;  %v222_v45 = vld [vmem:[#allocation7 + $0x60] sm:$0xff]  ;;  %v514_v46 = vpack.c.bf16 %v221_v44, %v220_v43  ;;  %v223_v47 = vld [vmem:[#allocation7 + $0x68] sm:$0xff]  ;;  %v224_v49 = vld [vmem:[#allocation7 + $0x70] sm:$0xff] }
  0x42   :  { %473 = vmatpush3.bf16.msra.mxu0 %v470_v8  ;;  %499 = vmatprep.subr.bf16.mxu1 %v498_v33  ;;  %v518_v48 = vpack.c.bf16 %v223_v47, %v222_v45  ;;  %v225_v50 = vld [vmem:[#allocation7 + $0x78] sm:$0xff]  ;;  %v344_v52 = vld [vmem:[%s761_s2] ss:$0 sm:$0xff] }
  0x43   :  { %475 = vmatprep.subr.bf16.mxu0 %v474_v12  ;;  %v522_v51 = vpack.c.bf16 %v225_v50, %v224_v49  ;;  %v345_v37 = vld [vmem:[%s763_s4] ss:$0 sm:$0xff]  ;;  %s606_s4 = scalar_lea.vmem %s332_s9, 512 }
  0x44   :  { %p607_p10 = scmp.ne.s32.totalorder %s332_s9, %s606_s4  ;;  %p612_p12 = scmp.lt.s32.totalorder %s606_s4, %s606_s4 }
  0x45   :  { %501 = vmatpush3.bf16.msra.mxu1 %v498_v33 }
  0x46   :  { %477 = vmatpush3.bf16.msra.mxu0 %v474_v12  ;;  %503 = vmatprep.subr.bf16.mxu1 %v502_v36  ;;  %p613_p13 = por %p612_p12, %p611_p11 }
  0x47   :  { %479 = vmatprep.subr.bf16.mxu0 %v478_v15 }
  0x48   :  { %p614_p0 = pnand %p613_p13, %p607_p10 }
  0x49   :  { %505 = vmatpush3.bf16.msra.mxu1 %v502_v36 }
  0x4a   :  { %481 = vmatpush3.bf16.msra.mxu0 %v478_v15  ;;  %507 = vmatprep.subr.bf16.mxu1 %v506_v39 }
  0x4b   :  { %483 = vmatprep.subr.bf16.mxu0 %v482_v18 }
  0x4d   :  { %509 = vmatpush3.bf16.msra.mxu1 %v506_v39 }
  0x4e   :  { %485 = vmatpush3.bf16.msra.mxu0 %v482_v18  ;;  %511 = vmatprep.subr.bf16.mxu1 %v510_v42 }
  0x4f   :  { %487 = vmatprep.subr.bf16.mxu0 %v486_v21 }
  0x51   :  { %513 = vmatpush3.bf16.msra.mxu1 %v510_v42 }
  0x52   :  { %489 = vmatpush3.bf16.msra.mxu0 %v486_v21  ;;  %515 = vmatprep.subr.bf16.mxu1 %v514_v46 }
  0x53   :  { %491 = vmatprep.subr.bf16.mxu0 %v490_v24 }
  0x55   :  { %517 = vmatpush3.bf16.msra.mxu1 %v514_v46 }
  0x56   :  { %493 = vmatpush3.bf16.msra.mxu0 %v490_v24  ;;  %519 = vmatprep.subr.bf16.mxu1 %v518_v48 }
  0x59   :  { %419 = vmatmul.mubr.f32.vlgmr.msra.gmra.mrb[0].mxu0 %v725_v25  ;;  %521 = vmatpush3.bf16.msra.mxu1 %v518_v48 }
  0x5a   :  { %421 = vmatprep.mubr.f32.mxu0 %v727_v26  ;;  %523 = vmatprep.subr.bf16.mxu1 %v522_v51 }
  0x5d   :  { %422 = vmatmul.mubr.f32.gmra.mrb[2].mxu0 %v731_v27  ;;  %525 = vmatpush3.bf16.msra.mxu1 %v522_v51 }
 0x12c   :  { %v420_v53 = vpop.f32.mrb[0].mxu0 }
 0x12d   :  { %v161_v54 = vadd.f32 %v420_v53, %v344_v52  ;;  %v155_v55 = vpop.f32.mrb[1].mxu0 }
 0x12e   :  { %v156_v56 = vadd.f32 %v344_v52, %v155_v55 }
 0x12f   :  { %v175_v57 = vmul.f32 %v161_v54, %v161_v54 }
 0x130   :  { %v174_v58 = vmul.f32 %v156_v56, %v156_v56  ;;  %v423_v59 = vpop.f32.mrb[2].mxu0 }
 0x131   :  { %v179_v60 = vmul.f32 %v175_v57, %v161_v54  ;;  %v171_v61 = vadd.f32 %v423_v59, %v344_v52  ;;  %v165_v62 = vpop.f32.mrb[3].mxu0 }
 0x132   :  { %v178_v63 = vmul.f32 %v174_v58, %v156_v56  ;;  %v166_v0 = vadd.f32 %v344_v52, %v165_v62 }
 0x133   :  { %v183_v1 = vmul.f32 0.044715, %v179_v60  ;;  %v177_v2 = vmul.f32 %v171_v61, %v171_v61 }
 0x134   :  { %v176_v3 = vmul.f32 %v166_v0, %v166_v0  ;;  %v182_v4 = vmul.f32 0.044715, %v178_v63 }
 0x135   :  { %v187_v5 = vadd.f32 %v183_v1, %v161_v54  ;;  %v181_v6 = vmul.f32 %v177_v2, %v171_v61 }
 0x136   :  { %v180_v7 = vmul.f32 %v176_v3, %v166_v0  ;;  %v186_v8 = vadd.f32 %v182_v4, %v156_v56 }
 0x137   :  { %v191_v10 = vmul.f32 0.7978846, %v187_v5  ;;  %v185_v11 = vmul.f32 0.044715, %v181_v6 }
 0x138   :  { %v184_v12 = vmul.f32 0.044715, %v180_v7  ;;  %v190_v13 = vmul.f32 0.7978846, %v186_v8 }
 0x139   :  { %v189_v14 = vadd.f32 %v185_v11, %v171_v61  ;;  %532 = vtanh.f32 %v191_v10 }
 0x13a   :  { %v188_v15 = vadd.f32 %v184_v12, %v166_v0  ;;  %534 = vtanh.f32 %v190_v13 }
 0x13b   :  { %v193_v16 = vmul.f32 0.7978846, %v189_v14 }
 0x13c   :  { %v192_v17 = vmul.f32 0.7978846, %v188_v15 }
 0x13d   :  { %536 = vtanh.f32 %v193_v16 }
 0x13e   :  { %538 = vtanh.f32 %v192_v17 }
 0x143   :  { %v533_v18 = vpop.eup %532 }
 0x144   :  { %v535_v19 = vpop.eup %534  ;;  %v199_v20 = vadd.f32 1.0, %v533_v18 }
 0x145   :  { %v198_v21 = vadd.f32 1.0, %v535_v19 }
 0x146   :  { %v203_v22 = vmul.f32 0.5, %v199_v20 }
 0x147   :  { %v537_v23 = vpop.eup %536  ;;  %v202_v24 = vmul.f32 0.5, %v198_v21 }
 0x148   :  { %v539_v28 = vpop.eup %538  ;;  %v201_v29 = vadd.f32 1.0, %v537_v23  ;;  %v207_v32 = vmul.f32 %v203_v22, %v161_v54 }
 0x149   :  { %v206_v30 = vmul.f32 %v202_v24, %v156_v56  ;;  %v200_v31 = vadd.f32 1.0, %v539_v28 }
 0x14a   :  { %v205_v33 = vmul.f32 0.5, %v201_v29 }
 0x14b   :  { %456 = vmatprep.mubr.f32.mxu1 %v206_v30  ;;  %v204_v34 = vmul.f32 0.5, %v200_v31 }
 0x14c   :  { %457 = vmatmul.mubr.f32.vlgmr.msra.gmra.mrb[0].mxu1 %v207_v32  ;;  %v209_v36 = vmul.f32 %v205_v33, %v171_v61 }
 0x14d   :  { %v208_v35 = vmul.f32 %v204_v34, %v166_v0 }
 0x14f   :  { %459 = vmatprep.mubr.f32.mxu1 %v208_v35 }
 0x150   :  { %460 = vmatmul.mubr.f32.gmra.mrb[2].mxu1 %v209_v36 }
 0x21f   :  { %v458_v38 = vpop.f32.mrb[0].mxu1 }
 0x220   :  { %v305_v39 = vadd.f32 %v458_v38, %v345_v37  ;;  %v299_v40 = vpop.f32.mrb[1].mxu1 }
 0x221   :  { %v300_v41 = vadd.f32 %v345_v37, %v299_v40 }
 0x222   :  { %v319_v42 = vadd.f32 %v305_v39, %v725_v25 }
 0x223   :  { %v318_v43 = vadd.f32 %v300_v41, %v722_v9  ;;  %v461_v44 = vpop.f32.mrb[2].mxu1 }
 0x224   :  { %323 = vst [vmem:[#allocation8 + $0x8] sm:$0xff] %v319_v42  ;;  %v315_v45 = vadd.f32 %v461_v44, %v345_v37  ;;  %v309_v46 = vpop.f32.mrb[3].mxu1 }
 0x225   :  { %322 = vst [vmem:[#allocation8] sm:$0xff] %v318_v43  ;;  %v310_v47 = vadd.f32 %v345_v37, %v309_v46 }
 0x226   :  { %v321_v48 = vadd.f32 %v315_v45, %v731_v27 }
 0x227   :  { %v320_v49 = vadd.f32 %v310_v47, %v727_v26 }
 0x228   :  { %325 = vst [vmem:[#allocation8 + $0x18] sm:$0xff] %v321_v48 }
 0x229   :  { %324 = vst [vmem:[#allocation8 + $0x10] sm:$0xff] %v320_v49 }
 0x22a   :  { %617 = shalt.err (!%p614_p0)
}
 0x22b   :  { %s618_s12 = scalar_lea.hbm %s764_s5, 512 }
 0x22c   :  { %p619_p1 = scmp.ne.s32.totalorder %s764_s5, %s618_s12  ;;  %p622_p2 = scmp.lt.u32.totalorder %s618_s12, %s764_s5 }
 0x22e   :  { %p624_p3 = pnand %p622_p2, %p619_p1 }
 0x230   :  { %627 = shalt.err (!%p624_p3)
}
 0x231   :  { %337 = dma.vmem_to_hbm [thread:$0]  %s332_s9, 512, %s764_s5, [#allocation4], %s636_s30, %s636_s30, %s637_s6  }
 0x232   :  { %632 = dma.done.wait [#allocation4], 512  }
 0x233   :  { %633 = vsyncadd [#allocation4], 4294966784 }
 0x234   :  { %341 = vsyncpa [#allocation3], 1 }
 0x235   :  { %342 = vsyncpa [#allocation6], 1 }
 0x236   :  { %343 = vsyncpa [#allocation4], 1 }

</bundles_post_ra>
